<compile_context>
chip_gen: v7x
topology: tpu7x:2x2x1
jax: 0.10.0
libtpu: 0.0.40
codegen_flags: <defaults>
</compile_context>

<pallas_src>
import math

import jax
import jax.numpy as jnp
import numpy as np
from jax.experimental import pallas as pl
from jax.experimental.pallas import tpu as pltpu

N_NODES = 16
N_EDGES = 64

IN_DIM = 16                          # 16x0e
SH_DIM = 4                           # 1x0e + 1x1o
C0 = 16                              # out 0e multiplicity
C1 = 8                               # out 1o multiplicity
OUT_DIM = C0 + 3 * C1                # 40
N_EDGE_FEAT = 16
HIDDEN = 16
W_NUMEL = IN_DIM * C0 + IN_DIM * C1  # 384
PATH_NORM = 1.0 / math.sqrt(IN_DIM)
BN_EPS = 1e-5
PAD_OUT = 128                        # lane-dense output width
KDIM = IN_DIM * HIDDEN + IN_DIM      # 272: kron block (256) + bias/x_e block (16)


def _tpconv_kernel(node_ref, dst_ref, src_ref, ef_ref, w1_ref, em_ref,
                   wb_ref, cn_ref, out_ref):
    f32 = jnp.float32
    e = ef_ref.shape[0]
    n = node_ref.shape[0]

    # ---- gather node_attr[edge_dst] via canonical one-hot matmul (MXU) ----
    ids_en = jax.lax.broadcasted_iota(jnp.int32, (e, n), 1)
    oh_dst = (dst_ref[...] == ids_en).astype(f32)                        # [E,N]
    x_e = jnp.dot(oh_dst, node_ref[...], preferred_element_type=f32)     # [E,16]

    # ---- fc(edge_attr): Linear (bias folded) -> ReLU; col 16 is a constant 1 ----
    h_aug = jnp.maximum(
        jnp.dot(ef_ref[...], w1_ref[...], preferred_element_type=f32), 0.0)  # [E,17]

    # ---- lane-dense 2D Kronecker block via 0/1 expansion matmuls ----
    # xk[:, i*16+j] = x_e[:,i], hk[:, i*16+j] = h[:,j]; cols 256:272 carry x_e
    # (bias path) against ones, so kmat = [x_e (x) h | x_e]  in pure 2D.
    xk = jnp.dot(x_e, em_ref[0:IN_DIM, :], preferred_element_type=f32)        # [E,272]
    hk = jnp.dot(h_aug, em_ref[IN_DIM:IN_DIM + HIDDEN + 1, :],
                 preferred_element_type=f32)                                  # [E,272]
    kmat = xk * hk                                                            # [E,272]

    # ---- fused fc.3 + tensor-product radial part (+bias, +path-norm,
    #      +(mul,2l+1) expansion) and SH broadcast, both 128 lanes wide ----
    radial = jnp.dot(kmat, wb_ref[0:KDIM, :], preferred_element_type=f32)     # [E,128]
    shx = jnp.dot(ef_ref[:, N_EDGE_FEAT:N_EDGE_FEAT + SH_DIM],
                  wb_ref[KDIM:KDIM + SH_DIM, :], preferred_element_type=f32)  # [E,128]
    tp_full = radial * shx                                                    # [E,128]

    # ---- scatter-mean onto edge_src: transposed one-hot, canonical matmul ----
    ids_ne = jax.lax.broadcasted_iota(jnp.int32, (n, e), 0)
    oh_src_t = (ids_ne == src_ref[...]).astype(f32)                           # [N,E]
    acc = jnp.dot(oh_src_t, tp_full, preferred_element_type=f32)              # [N,128]
    cnt = jnp.sum(oh_src_t, axis=1, keepdims=True)                            # [N,1]
    inv = 1.0 / jnp.maximum(cnt, 1.0)

    # ---- residual (zero-padded, pre-scaled through BN via diag matmul)
    #      + eval-mode BatchNorm affine ----
    res_bn = jnp.dot(node_ref[...], cn_ref[0:IN_DIM, :],
                     preferred_element_type=f32)                              # [N,128]
    bn_rows = cn_ref[IN_DIM:IN_DIM + 2, :]                                    # [2,128]
    out_ref[...] = acc * (inv * bn_rows[0:1, :]) + res_bn + bn_rows[1:2, :]


def tensor_product_conv(node_attr, edge_index, edge_attr, edge_sh, params):
    n = node_attr.shape[0]
    e = edge_attr.shape[0]
    edge_src = edge_index[0].astype(jnp.int32).reshape(1, e)
    edge_dst = edge_index[1].astype(jnp.int32).reshape(e, 1)

    # ---- packed edge features: [edge_attr | edge_sh | 1] -> [E, 21] ----
    edge_feat = jnp.concatenate(
        [edge_attr, edge_sh, jnp.ones((e, 1), jnp.float32)], axis=1)

    # ---- fc weights with b1 folded (row 20) and a ones-passthrough col 16 ----
    w1_full = jnp.zeros((N_EDGE_FEAT + SH_DIM + 1, HIDDEN + 1), jnp.float32)
    w1_full = w1_full.at[:N_EDGE_FEAT, :HIDDEN].set(params["w1"])
    w1_full = w1_full.at[N_EDGE_FEAT + SH_DIM, :HIDDEN].set(params["b1"][0])
    w1_full = w1_full.at[N_EDGE_FEAT + SH_DIM, HIDDEN].set(1.0)

    # ---- 0/1 kron expansion matrices (pure structure, numpy constants) ----
    k256 = IN_DIM * HIDDEN
    rrep = np.zeros((IN_DIM, KDIM), np.float32)
    rtile = np.zeros((HIDDEN + 1, KDIM), np.float32)
    for i in range(IN_DIM):
        rrep[i, i * HIDDEN:(i + 1) * HIDDEN] = 1.0
        rrep[i, k256 + i] = 1.0              # bias block carries x_e
        rtile[HIDDEN, k256 + i] = 1.0        # h_aug[:,16] == 1 -> ones there
    for j in range(HIDDEN):
        rtile[j, j:k256:HIDDEN] = 1.0
    expand_mat = jnp.asarray(np.concatenate([rrep, rtile], axis=0))   # [33, 272]

    # ---- fused radial weight wp_full [272, 128] ----
    # wp24[i*H + j, c] = w2[j, path(i,c)], wp24[256+i, c] = b2[0, path(i,c)],
    # all * PATH_NORM, then expanded to the (mul, 2l+1) output layout (40 cols)
    # and zero-padded to 128 lanes.
    w2, b2 = params["w2"], params["b2"]
    w2_0 = w2[:, :IN_DIM * C0].reshape(HIDDEN, IN_DIM, C0).transpose(1, 0, 2)
    w2_1 = w2[:, IN_DIM * C0:].reshape(HIDDEN, IN_DIM, C1).transpose(1, 0, 2)
    wp24 = jnp.concatenate(
        [jnp.concatenate([w2_0.reshape(IN_DIM * HIDDEN, C0),
                          w2_1.reshape(IN_DIM * HIDDEN, C1)], axis=1),
         jnp.concatenate([b2[0, :IN_DIM * C0].reshape(IN_DIM, C0),
                          b2[0, IN_DIM * C0:].reshape(IN_DIM, C1)], axis=1)],
        axis=0) * PATH_NORM                                            # [272, 24]

    rexp = np.zeros((C0 + C1, PAD_OUT), np.float32)
    g_sh = np.zeros((SH_DIM, PAD_OUT), np.float32)
    for c in range(C0):
        rexp[c, c] = 1.0
    g_sh[0, :C0] = 1.0
    for c in range(C1):
        for m in range(3):
            rexp[C0 + c, C0 + 3 * c + m] = 1.0
            g_sh[1 + m, C0 + 3 * c + m] = 1.0
    wp_full = wp24 @ jnp.asarray(rexp)                                 # [272, 128]
    w_big = jnp.concatenate([wp_full, jnp.asarray(g_sh)], axis=0)      # [276, 128]

    # ---- node-side constants: residual-through-BN diag, BN scale/shift rows ----
    bn_scale = jnp.pad(params["bn_scale"], ((0, 0), (0, PAD_OUT - OUT_DIM)))  # [1,128]
    bn_shift = jnp.pad(params["bn_shift"], ((0, 0), (0, PAD_OUT - OUT_DIM)))  # [1,128]
    s_res = jnp.pad(jnp.diag(bn_scale[0, :IN_DIM]),
                    ((0, 0), (0, PAD_OUT - IN_DIM)))                          # [16,128]
    const_nodes = jnp.concatenate([s_res, bn_scale, bn_shift], axis=0)        # [18,128]

    vmem = pl.BlockSpec(memory_space=pltpu.MemorySpace.VMEM)
    out_pad = pl.pallas_call(
        _tpconv_kernel,
        out_shape=jax.ShapeDtypeStruct((n, PAD_OUT), jnp.float32),
        in_specs=[vmem] * 8,
        out_specs=vmem,
    )(node_attr, edge_dst, edge_src, edge_feat, w1_full, expand_mat,
      w_big, const_nodes)
    return out_pad[:, :OUT_DIM]


def reference(node_attr, edge_index, edge_attr, edge_sh, params):
    """Pure-JAX reference of the same forward pass (for verification)."""
    edge_src, edge_dst = edge_index[0], edge_index[1]
    e = edge_attr.shape[0]
    n = node_attr.shape[0]
    x_e = node_attr[edge_dst]
    h = jax.nn.relu(edge_attr @ params["w1"] + params["b1"])
    w = h @ params["w2"] + params["b2"]
    w0 = w[:, :IN_DIM * C0].reshape(e, IN_DIM, C0)
    w1 = w[:, IN_DIM * C0:].reshape(e, IN_DIM, C1)
    out0 = jnp.einsum("ei,eic->ec", x_e, w0) * edge_sh[:, :1] * PATH_NORM
    v1 = jnp.einsum("ei,eic->ec", x_e, w1) * PATH_NORM
    out1 = (v1[:, :, None] * edge_sh[:, None, 1:4]).reshape(e, 3 * C1)
    tp = jnp.concatenate([out0, out1], axis=1)
    sums = jax.ops.segment_sum(tp, edge_src, num_segments=n)
    cnt = jax.ops.segment_sum(jnp.ones((e,)), edge_src, num_segments=n)
    mean = sums / jnp.maximum(cnt, 1.0)[:, None]
    out = mean + jnp.pad(node_attr, ((0, 0), (0, OUT_DIM - IN_DIM)))
    return out * params["bn_scale"] + params["bn_shift"]


def make_params(key):
    ks = jax.random.split(key, 8)
    w1 = 0.1 * jax.random.normal(ks[0], (N_EDGE_FEAT, HIDDEN), jnp.float32)
    b1 = 0.01 * jax.random.normal(ks[1], (1, HIDDEN), jnp.float32)
    w2 = 0.1 * jax.random.normal(ks[2], (HIDDEN, W_NUMEL), jnp.float32)
    b2 = 0.01 * jax.random.normal(ks[3], (1, W_NUMEL), jnp.float32)

    # e3nn BatchNorm(out_irreps) params/stats (eval mode), folded per column.
    bn_weight = 1.0 + 0.1 * jax.random.normal(ks[4], (C0 + C1,), jnp.float32)
    bn_bias = 0.05 * jax.random.normal(ks[5], (C0,), jnp.float32)
    run_mean = 0.02 * jax.random.normal(ks[6], (C0,), jnp.float32)
    run_var = 0.9 + 0.2 * jax.random.uniform(ks[7], (C0 + C1,), jnp.float32)

    scale_s = bn_weight[:C0] / jnp.sqrt(run_var[:C0] + BN_EPS)
    shift_s = bn_bias - run_mean * scale_s
    scale_v = jnp.repeat(bn_weight[C0:] / jnp.sqrt(run_var[C0:] + BN_EPS), 3)
    bn_scale = jnp.concatenate([scale_s, scale_v]).reshape(1, OUT_DIM)
    bn_shift = jnp.concatenate([shift_s, jnp.zeros((3 * C1,))]).reshape(1, OUT_DIM)

    return dict(w1=w1, b1=b1, w2=w2, b2=b2, bn_scale=bn_scale, bn_shift=bn_shift)


if __name__ == "__main__":
    key = jax.random.PRNGKey(0)
    k0, k1, k2, k3, kp = jax.random.split(key, 5)

    node_attr = jax.random.normal(k0, (N_NODES, IN_DIM), jnp.float32)
    edge_index = jax.random.randint(k1, (2, N_EDGES), 0, N_NODES, dtype=jnp.int32)
    edge_attr = jax.random.normal(k2, (N_EDGES, N_EDGE_FEAT), jnp.float32)
    vec = jax.random.normal(k3, (N_EDGES, 3), jnp.float32)
    vec = vec / jnp.linalg.norm(vec, axis=1, keepdims=True)
    edge_sh = jnp.concatenate(                     # component-normalized Y0, Y1
        [jnp.ones((N_EDGES, 1), jnp.float32), math.sqrt(3.0) * vec], axis=1)

    params = make_params(kp)

    fwd = jax.jit(tensor_product_conv)
    out = jax.block_until_ready(fwd(node_attr, edge_index, edge_attr, edge_sh, params))

    ref = jax.block_until_ready(
        reference(node_attr, edge_index, edge_attr, edge_sh, params))
    np.testing.assert_allclose(np.asarray(out), np.asarray(ref),
                               rtol=2e-4, atol=2e-4)
    print("KERNEL_OK")
</pallas_src>

<mosaic_0001>
module attributes {stable_mosaic.version = 11 : i64} {
  func.func @_tpconv_kernel(%arg0: memref<16x16xf32, #tpu.memory_space<vmem>>, %arg1: memref<64x1xi32, #tpu.memory_space<vmem>>, %arg2: memref<1x64xi32, #tpu.memory_space<vmem>>, %arg3: memref<64x21xf32, #tpu.memory_space<vmem>>, %arg4: memref<21x17xf32, #tpu.memory_space<vmem>>, %arg5: memref<33x272xf32, #tpu.memory_space<vmem>>, %arg6: memref<276x128xf32, #tpu.memory_space<vmem>>, %arg7: memref<18x128xf32, #tpu.memory_space<vmem>>, %arg8: memref<16x128xf32, #tpu.memory_space<vmem>>) attributes {dimension_semantics = [], scalar_prefetch = 0 : i64, scratch_operands = 0 : i64, tpu.core_type = #tpu.core_type<tc>} {
    %0 = tpu.iota {dimensions = array<i32: 1>} : vector<64x16xi32>
    %c0 = arith.constant 0 : index
    %c0_0 = arith.constant 0 : index
    %1 = vector.load %arg1[%c0, %c0_0] : memref<64x1xi32, #tpu.memory_space<vmem>>, vector<64x1xi32>
    %2 = vector.broadcast %1 : vector<64x1xi32> to vector<64x16xi32>
    %3 = arith.cmpi eq, %2, %0 : vector<64x16xi32>
    %4 = arith.extui %3 : vector<64x16xi1> to vector<64x16xi32>
    %5 = arith.sitofp %4 : vector<64x16xi32> to vector<64x16xf32>
    %c0_1 = arith.constant 0 : index
    %c0_2 = arith.constant 0 : index
    %6 = vector.load %arg0[%c0_1, %c0_2] : memref<16x16xf32, #tpu.memory_space<vmem>>, vector<16x16xf32>
    %cst = arith.constant dense<0.000000e+00> : vector<64x16xf32>
    %7 = tpu.matmul %5, %6, %cst {dimension_numbers = #tpu.dot_dimension_numbers<[1], [0], [0], [1], [0, 0, 1, 1], [], []>} : vector<64x16xf32>, vector<16x16xf32>, vector<64x16xf32> -> vector<64x16xf32>
    %c0_3 = arith.constant 0 : index
    %c0_4 = arith.constant 0 : index
    %8 = vector.load %arg3[%c0_3, %c0_4] : memref<64x21xf32, #tpu.memory_space<vmem>>, vector<64x21xf32>
    %c0_5 = arith.constant 0 : index
    %c0_6 = arith.constant 0 : index
    %9 = vector.load %arg4[%c0_5, %c0_6] : memref<21x17xf32, #tpu.memory_space<vmem>>, vector<21x17xf32>
    %cst_7 = arith.constant dense<0.000000e+00> : vector<64x17xf32>
    %10 = tpu.matmul %8, %9, %cst_7 {dimension_numbers = #tpu.dot_dimension_numbers<[1], [0], [0], [1], [0, 0, 1, 1], [], []>} : vector<64x21xf32>, vector<21x17xf32>, vector<64x17xf32> -> vector<64x17xf32>
    %cst_8 = arith.constant 0.000000e+00 : f32
    %11 = vector.broadcast %cst_8 : f32 to vector<64x17xf32>
    %12 = arith.maximumf %10, %11 : vector<64x17xf32>
    %c0_9 = arith.constant 0 : index
    %c0_10 = arith.constant 0 : index
    %13 = vector.load %arg5[%c0_9, %c0_10] : memref<33x272xf32, #tpu.memory_space<vmem>>, vector<16x272xf32>
    %cst_11 = arith.constant dense<0.000000e+00> : vector<64x272xf32>
    %14 = tpu.matmul %7, %13, %cst_11 {dimension_numbers = #tpu.dot_dimension_numbers<[1], [0], [0], [1], [0, 0, 1, 1], [], []>} : vector<64x16xf32>, vector<16x272xf32>, vector<64x272xf32> -> vector<64x272xf32>
    %c16 = arith.constant 16 : index
    %c0_12 = arith.constant 0 : index
    %15 = vector.load %arg5[%c16, %c0_12] : memref<33x272xf32, #tpu.memory_space<vmem>>, vector<17x272xf32>
    %cst_13 = arith.constant dense<0.000000e+00> : vector<64x272xf32>
    %16 = tpu.matmul %12, %15, %cst_13 {dimension_numbers = #tpu.dot_dimension_numbers<[1], [0], [0], [1], [0, 0, 1, 1], [], []>} : vector<64x17xf32>, vector<17x272xf32>, vector<64x272xf32> -> vector<64x272xf32>
    %17 = arith.mulf %14, %16 : vector<64x272xf32>
    %c0_14 = arith.constant 0 : index
    %c0_15 = arith.constant 0 : index
    %18 = vector.load %arg6[%c0_14, %c0_15] : memref<276x128xf32, #tpu.memory_space<vmem>>, vector<272x128xf32>
    %cst_16 = arith.constant dense<0.000000e+00> : vector<64x128xf32>
    %19 = tpu.matmul %17, %18, %cst_16 {dimension_numbers = #tpu.dot_dimension_numbers<[1], [0], [0], [1], [0, 0, 1, 1], [], []>} : vector<64x272xf32>, vector<272x128xf32>, vector<64x128xf32> -> vector<64x128xf32>
    %c0_17 = arith.constant 0 : index
    %c16_18 = arith.constant 16 : index
    %20 = vector.load %arg3[%c0_17, %c16_18] : memref<64x21xf32, #tpu.memory_space<vmem>>, vector<64x4xf32>
    %c272 = arith.constant 272 : index
    %c0_19 = arith.constant 0 : index
    %21 = vector.load %arg6[%c272, %c0_19] : memref<276x128xf32, #tpu.memory_space<vmem>>, vector<4x128xf32>
    %cst_20 = arith.constant dense<0.000000e+00> : vector<64x128xf32>
    %22 = tpu.matmul %20, %21, %cst_20 {dimension_numbers = #tpu.dot_dimension_numbers<[1], [0], [0], [1], [0, 0, 1, 1], [], []>} : vector<64x4xf32>, vector<4x128xf32>, vector<64x128xf32> -> vector<64x128xf32>
    %23 = arith.mulf %19, %22 : vector<64x128xf32>
    %24 = tpu.iota {dimensions = array<i32: 0>} : vector<16x64xi32>
    %c0_21 = arith.constant 0 : index
    %c0_22 = arith.constant 0 : index
    %25 = vector.load %arg2[%c0_21, %c0_22] : memref<1x64xi32, #tpu.memory_space<vmem>>, vector<1x64xi32>
    %26 = vector.broadcast %25 : vector<1x64xi32> to vector<16x64xi32>
    %27 = arith.cmpi eq, %24, %26 : vector<16x64xi32>
    %28 = arith.extui %27 : vector<16x64xi1> to vector<16x64xi32>
    %29 = arith.sitofp %28 : vector<16x64xi32> to vector<16x64xf32>
    %cst_23 = arith.constant dense<0.000000e+00> : vector<16x128xf32>
    %30 = tpu.matmul %29, %23, %cst_23 {dimension_numbers = #tpu.dot_dimension_numbers<[1], [0], [0], [1], [0, 0, 1, 1], [], []>} : vector<16x64xf32>, vector<64x128xf32>, vector<16x128xf32> -> vector<16x128xf32>
    %cst_24 = arith.constant dense<0.000000e+00> : vector<16xf32>
    %31 = vector.multi_reduction <add>, %29, %cst_24 [1] : vector<16x64xf32> to vector<16xf32>
    %32 = vector.shape_cast %31 : vector<16xf32> to vector<16x1xf32>
    %cst_25 = arith.constant 1.000000e+00 : f32
    %33 = vector.broadcast %cst_25 : f32 to vector<16x1xf32>
    %34 = arith.maximumf %32, %33 : vector<16x1xf32>
    %cst_26 = arith.constant 1.000000e+00 : f32
    %35 = vector.broadcast %cst_26 : f32 to vector<16x1xf32>
    %36 = arith.divf %35, %34 : vector<16x1xf32>
    %c0_27 = arith.constant 0 : index
    %c0_28 = arith.constant 0 : index
    %37 = vector.load %arg0[%c0_27, %c0_28] : memref<16x16xf32, #tpu.memory_space<vmem>>, vector<16x16xf32>
    %c0_29 = arith.constant 0 : index
    %c0_30 = arith.constant 0 : index
    %38 = vector.load %arg7[%c0_29, %c0_30] : memref<18x128xf32, #tpu.memory_space<vmem>>, vector<16x128xf32>
    %cst_31 = arith.constant dense<0.000000e+00> : vector<16x128xf32>
    %39 = tpu.matmul %37, %38, %cst_31 {dimension_numbers = #tpu.dot_dimension_numbers<[1], [0], [0], [1], [0, 0, 1, 1], [], []>} : vector<16x16xf32>, vector<16x128xf32>, vector<16x128xf32> -> vector<16x128xf32>
    %c16_32 = arith.constant 16 : index
    %c0_33 = arith.constant 0 : index
    %40 = vector.load %arg7[%c16_32, %c0_33] : memref<18x128xf32, #tpu.memory_space<vmem>>, vector<2x128xf32>
    %41 = vector.extract_strided_slice %40 {offsets = [0, 0], sizes = [1, 128], strides = [1, 1]} : vector<2x128xf32> to vector<1x128xf32>
    %42 = vector.broadcast %36 : vector<16x1xf32> to vector<16x128xf32>
    %43 = vector.broadcast %41 : vector<1x128xf32> to vector<16x128xf32>
    %44 = arith.mulf %42, %43 : vector<16x128xf32>
    %45 = arith.mulf %30, %44 : vector<16x128xf32>
    %46 = arith.addf %45, %39 : vector<16x128xf32>
    %47 = vector.extract_strided_slice %40 {offsets = [1, 0], sizes = [1, 128], strides = [1, 1]} : vector<2x128xf32> to vector<1x128xf32>
    %48 = vector.broadcast %47 : vector<1x128xf32> to vector<16x128xf32>
    %49 = arith.addf %46, %48 : vector<16x128xf32>
    %c0_34 = arith.constant 0 : index
    %c0_35 = arith.constant 0 : index
    %50 = vector.load %arg8[%c0_34, %c0_35] : memref<16x128xf32, #tpu.memory_space<vmem>>, vector<16x128xf32>
    tpu.vector_store %arg8[%c0_34, %c0_35], %49 {strides = array<i32>} : memref<16x128xf32, #tpu.memory_space<vmem>>, vector<16x128xf32>,
    return
  }
}

</mosaic_0001>

<bundles_post_ra>
// kernel: squeeze.7
= control target key start
LH: loop header
LB: loop body
LE: loop exit
PB: predicated region body
PF: predicated region fallthrough
CT: control target
= control target key end

     0   :  { %s66_s8 = smov 80   ;;  %vm7_vm0 = vcmask 130048   ;;  %s67_s11 = smov 96   ;;  %s117_s0 = inlined_call_operand.vmem [shape: f32[256], index: 0, kind: input, shape index: {}]   ;;  %s118_s1 = inlined_call_operand.vmem [shape: f32[16,16], index: 1, kind: output, shape index: {}]  }
   0x1   :  { %v4_v0 = vld [vmem:[%s117_s0] sm:$0x3]  ;;  %s65_s0 = smov 112   ;;  %s68_s12 = smov 64  }
   0x2   :  { %5 = vst [vmem:[#allocation0] sm:$0x3] %v4_v0  ;;  %s69_s13 = smov 48   ;;  %s70_s14 = smov 32  }
   0x3   :  { %s71_s15 = smov 16  }
   0x9   :  { %v9_v1 = vld [vmem:[#allocation0] sm:$0x3]  }
   0xa   :  { %v21_v2 = vld [vmem:[#allocation0] sm:$0x3]   ;;  %10 = vrot.lane.b32.xlu0 %v9_v1, %s65_s0 }
   0xb   :  { %22 = vrot.lane.b32.xlu1 %v21_v2, %s66_s8  ;;  %v15_v3 = vld [vmem:[#allocation0] sm:$0x3]  }
   0xc   :  { %v27_v4 = vld [vmem:[#allocation0] sm:$0x3]  }
   0xd   :  { %v6_v5 = vld [vmem:[#allocation0] sm:$0x3]  }
   0xe   :  { %8 = vst.msk [vmem:[%s118_s1] ss:$8 sm:$0x3] %vm7_vm0, %v6_v5   ;;  %16 = vrot.lane.b32.xlu0 %v15_v3, %s67_s11  ;;  %v33_v6 = vld [vmem:[#allocation0] sm:$0x3]  }
   0xf   :  { %28 = vrot.lane.b32.xlu1 %v27_v4, %s68_s12  ;;  %v39_v7 = vld [vmem:[#allocation0] sm:$0x3]  }
  0x10   :  { %v45_v8 = vld [vmem:[#allocation0] sm:$0x3]  }
  0x12   :  { %34 = vrot.lane.b32.xlu0 %v33_v6, %s69_s13 }
  0x13   :  { %40 = vrot.lane.b32.xlu1 %v39_v7, %s70_s14 }
  0x16   :  { %46 = vrot.lane.b32.xlu0 %v45_v8, %s71_s15 }
  0x7c   :  { %v11_v9 = vpop.permute.xlu0 %10  }
  0x7d   :  { %v23_v10 = vpop.permute.xlu1 %22   ;;  %51 = vst.msk [vmem:[%s118_s1 + $0x1] ss:$8 sm:$0x3] %vm7_vm0, %v11_v9  }
  0x7e   :  { %53 = vst.msk [vmem:[%s118_s1 + $0x3] ss:$8 sm:$0x3] %vm7_vm0, %v23_v10  }
  0x80   :  { %v17_v11 = vpop.permute.xlu0 %16  }
  0x81   :  { %v29_v12 = vpop.permute.xlu1 %28   ;;  %52 = vst.msk [vmem:[%s118_s1 + $0x2] ss:$8 sm:$0x3] %vm7_vm0, %v17_v11  }
  0x82   :  { %54 = vst.msk [vmem:[%s118_s1 + $0x4] ss:$8 sm:$0x3] %vm7_vm0, %v29_v12  }
  0x84   :  { %v35_v13 = vpop.permute.xlu0 %34  }
  0x85   :  { %v41_v14 = vpop.permute.xlu1 %40   ;;  %55 = vst.msk [vmem:[%s118_s1 + $0x5] ss:$8 sm:$0x3] %vm7_vm0, %v35_v13  }
  0x86   :  { %56 = vst.msk [vmem:[%s118_s1 + $0x6] ss:$8 sm:$0x3] %vm7_vm0, %v41_v14  }
  0x88   :  { %v47_v15 = vpop.permute.xlu0 %46  }
  0x89   :  { %57 = vst.msk [vmem:[%s118_s1 + $0x7] ss:$8 sm:$0x3] %vm7_vm0, %v47_v15  }

// kernel: squeeze.8
= control target key start
LH: loop header
LB: loop body
LE: loop exit
PB: predicated region body
PF: predicated region fallthrough
CT: control target
= control target key end

     0   :  { %s130_s8 = smov 104   ;;  %s131_s9 = smov 112   ;;  %vm7_vm0 = vcmask 64512   ;;  %s221_s0 = inlined_call_operand.vmem [shape: f32[128], index: 0, kind: input, shape index: {}]   ;;  %s222_s1 = inlined_call_operand.vmem [shape: f32[16,8], index: 1, kind: output, shape index: {}]  }
   0x1   :  { %v4_v0 = vld [vmem:[%s221_s0] sm:$0x1]  ;;  %s129_s0 = smov 120   ;;  %s132_s10 = smov 96  }
   0x2   :  { %5 = vst [vmem:[#allocation0] sm:$0x1] %v4_v0  ;;  %s133_s11 = smov 88   ;;  %s134_s12 = smov 80  }
   0x3   :  { %s135_s13 = smov 72   ;;  %s136_s14 = smov 64  }
   0x4   :  { %s137_s17 = smov 56   ;;  %s138_s18 = smov 48  }
   0x5   :  { %s139_s19 = smov 40   ;;  %s140_s20 = smov 32  }
   0x6   :  { %s141_s21 = smov 24   ;;  %s142_s22 = smov 16  }
   0x7   :  { %s143_s23 = smov 8  }
   0x9   :  { %v9_v1 = vld [vmem:[#allocation0] sm:$0x1]  }
   0xa   :  { %v21_v2 = vld [vmem:[#allocation0] sm:$0x1]   ;;  %10 = vrot.lane.b32.xlu0 %v9_v1, %s129_s0 }
   0xb   :  { %22 = vrot.lane.b32.xlu1 %v21_v2, %s130_s8  ;;  %v15_v3 = vld [vmem:[#allocation0] sm:$0x1]  }
   0xc   :  { %v27_v4 = vld [vmem:[#allocation0] sm:$0x1]  }
   0xd   :  { %v33_v5 = vld [vmem:[#allocation0] sm:$0x1]  }
   0xe   :  { %16 = vrot.lane.b32.xlu0 %v15_v3, %s131_s9  ;;  %v39_v6 = vld [vmem:[#allocation0] sm:$0x1]  }
   0xf   :  { %28 = vrot.lane.b32.xlu1 %v27_v4, %s132_s10  ;;  %v45_v7 = vld [vmem:[#allocation0] sm:$0x1]  }
  0x10   :  { %v51_v8 = vld [vmem:[#allocation0] sm:$0x1]  }
  0x11   :  { %v57_v9 = vld [vmem:[#allocation0] sm:$0x1]  }
  0x12   :  { %34 = vrot.lane.b32.xlu0 %v33_v5, %s133_s11  ;;  %v63_v10 = vld [vmem:[#allocation0] sm:$0x1]  }
  0x13   :  { %40 = vrot.lane.b32.xlu1 %v39_v6, %s134_s12  ;;  %v6_v11 = vld [vmem:[#allocation0] sm:$0x1]  }
  0x14   :  { %8 = vst.msk [vmem:[%s222_s1] sm:$0x1] %vm7_vm0, %v6_v11   ;;  %v69_v12 = vld [vmem:[#allocation0] sm:$0x1]  }
  0x15   :  { %v75_v13 = vld [vmem:[#allocation0] sm:$0x1]  }
  0x16   :  { %46 = vrot.lane.b32.xlu0 %v45_v7, %s135_s13  ;;  %v81_v14 = vld [vmem:[#allocation0] sm:$0x1]  }
  0x17   :  { %52 = vrot.lane.b32.xlu1 %v51_v8, %s136_s14  ;;  %v87_v15 = vld [vmem:[#allocation0] sm:$0x1]  }
  0x18   :  { %v93_v16 = vld [vmem:[#allocation0] sm:$0x1]  }
  0x1a   :  { %58 = vrot.lane.b32.xlu0 %v57_v9, %s137_s17 }
  0x1b   :  { %64 = vrot.lane.b32.xlu1 %v63_v10, %s138_s18 }
  0x1e   :  { %70 = vrot.lane.b32.xlu0 %v69_v12, %s139_s19 }
  0x1f   :  { %76 = vrot.lane.b32.xlu1 %v75_v13, %s140_s20 }
  0x22   :  { %82 = vrot.lane.b32.xlu0 %v81_v14, %s141_s21 }
  0x23   :  { %88 = vrot.lane.b32.xlu1 %v87_v15, %s142_s22 }
  0x26   :  { %94 = vrot.lane.b32.xlu0 %v93_v16, %s143_s23 }
  0x7c   :  { %v11_v17 = vpop.permute.xlu0 %10  }
  0x7d   :  { %v23_v18 = vpop.permute.xlu1 %22   ;;  %99 = vst.msk [vmem:[%s222_s1 + $0x1] sm:$0x1] %vm7_vm0, %v11_v17  }
  0x7e   :  { %101 = vst.msk [vmem:[%s222_s1 + $0x3] sm:$0x1] %vm7_vm0, %v23_v18  }
  0x80   :  { %v17_v19 = vpop.permute.xlu0 %16  }
  0x81   :  { %v29_v20 = vpop.permute.xlu1 %28   ;;  %100 = vst.msk [vmem:[%s222_s1 + $0x2] sm:$0x1] %vm7_vm0, %v17_v19  }
  0x82   :  { %102 = vst.msk [vmem:[%s222_s1 + $0x4] sm:$0x1] %vm7_vm0, %v29_v20  }
  0x84   :  { %v35_v21 = vpop.permute.xlu0 %34  }
  0x85   :  { %v41_v22 = vpop.permute.xlu1 %40   ;;  %103 = vst.msk [vmem:[%s222_s1 + $0x5] sm:$0x1] %vm7_vm0, %v35_v21  }
  0x86   :  { %104 = vst.msk [vmem:[%s222_s1 + $0x6] sm:$0x1] %vm7_vm0, %v41_v22  }
  0x88   :  { %v47_v23 = vpop.permute.xlu0 %46  }
  0x89   :  { %v53_v24 = vpop.permute.xlu1 %52   ;;  %105 = vst.msk [vmem:[%s222_s1 + $0x7] sm:$0x1] %vm7_vm0, %v47_v23  }
  0x8a   :  { %106 = vst.msk [vmem:[%s222_s1 + $0x8] sm:$0x1] %vm7_vm0, %v53_v24  }
  0x8c   :  { %v59_v25 = vpop.permute.xlu0 %58  }
  0x8d   :  { %v65_v26 = vpop.permute.xlu1 %64   ;;  %107 = vst.msk [vmem:[%s222_s1 + $0x9] sm:$0x1] %vm7_vm0, %v59_v25  }
  0x8e   :  { %108 = vst.msk [vmem:[%s222_s1 + $0xa] sm:$0x1] %vm7_vm0, %v65_v26  }
  0x90   :  { %v71_v27 = vpop.permute.xlu0 %70  }
  0x91   :  { %v77_v28 = vpop.permute.xlu1 %76   ;;  %109 = vst.msk [vmem:[%s222_s1 + $0xb] sm:$0x1] %vm7_vm0, %v71_v27  }
  0x92   :  { %110 = vst.msk [vmem:[%s222_s1 + $0xc] sm:$0x1] %vm7_vm0, %v77_v28  }
  0x94   :  { %v83_v29 = vpop.permute.xlu0 %82  }
  0x95   :  { %v89_v30 = vpop.permute.xlu1 %88   ;;  %111 = vst.msk [vmem:[%s222_s1 + $0xd] sm:$0x1] %vm7_vm0, %v83_v29  }
  0x96   :  { %112 = vst.msk [vmem:[%s222_s1 + $0xe] sm:$0x1] %vm7_vm0, %v89_v30  }
  0x98   :  { %v95_v31 = vpop.permute.xlu0 %94  }
  0x99   :  { %113 = vst.msk [vmem:[%s222_s1 + $0xf] sm:$0x1] %vm7_vm0, %v95_v31  }

// kernel: tensor_product_conv.1
= control target key start
LH: loop header
LB: loop body
LE: loop exit
PB: predicated region body
PF: predicated region fallthrough
CT: control target
= control target key end

     0   :  { %v2007_v2 = vmov 0   ;;  %s2486_s0 = inlined_call_operand.vmem [shape: f32[16,16], index: 0, kind: input, shape index: {}]   ;;  %s2487_s1 = inlined_call_operand.vmem [shape: s32[64,1], index: 1, kind: input, shape index: {}]   ;;  %s2488_s2 = inlined_call_operand.vmem [shape: s32[1,64], index: 2, kind: input, shape index: {}]   ;;  %s2489_s3 = inlined_call_operand.vmem [shape: f32[64,21], index: 3, kind: input, shape index: {}]   ;;  %s2490_s4 = inlined_call_operand.vmem [shape: f32[21,17], index: 4, kind: input, shape index: {}]   ;;  %s2491_s5 = inlined_call_operand.vmem [shape: f32[33,272], index: 5, kind: input, shape index: {}]   ;;  %s2492_s6 = inlined_call_operand.vmem [shape: f32[276,128], index: 6, kind: input, shape index: {}]   ;;  %s2493_s7 = inlined_call_operand.vmem [shape: f32[18,128], index: 7, kind: input, shape index: {}]   ;;  %s2494_s8 = inlined_call_operand.hbm [shape: f32[16,128], index: 8, kind: output, shape index: {}]  }
   0x1   :  { %v34_v0 = vld [vmem:[%s2487_s1 + $0x10] sm:$0xff]  ;;  %v32_v1 = vld [vmem:[%s2487_s1] sm:$0xff]  ;;  %1978 = vset.pattern.permute.xlu1 %v2007_v2  ;;  %1977 = vset.pattern.permute.xlu0 %v2007_v2  ;;  %v35_v3 = vld [vmem:[%s2487_s1 + $0x18] sm:$0xff] }
   0x2   :  { %47 = vperm.xlu1 %1978, %v34_v0   ;;  %41 = vperm.xlu0 %1977, %v32_v1   ;;  %v2070_v4 = vld [vmem:[%s2486_s0] sm:$0xff]  ;;  %v33_v5 = vld [vmem:[%s2487_s1 + $0x8] sm:$0xff] }
   0x3   :  { %v2078_v6 = vld [vmem:[%s2486_s0 + $0x8] sm:$0xff] }
   0x4   :  { %13 = vsyncpa [#allocation3], 0  ;;  %v1891_v7 = vpack.c.bf16 %v2078_v6, %v2070_v4  ;;  %v37_v8 = vld [vmem:[%s2487_s1 + $0x28] sm:$0xff]  ;;  %v36_v9 = vld [vmem:[%s2487_s1 + $0x20] sm:$0xff]  ;;  %vm256_vm0 = vcmask 1044480   ;;  %vm231_vm1 = vcmask 171008   ;;  %v30_v30 = vlaneseq }
   0x5   :  { %v39_v10 = vld [vmem:[%s2487_s1 + $0x38] sm:$0xff]  ;;  %v38_v11 = vld [vmem:[%s2487_s1 + $0x30] sm:$0xff]  ;;  %v228_v12 = vld [vmem:[%s2490_s4] sm:$0xff]  ;;  %vm90_vm2 = vcmask 130048   ;;  %v2008_v36 = vmov 0.0   ;;  %s2009_s16 = smov 112  }
   0x6   :  { %50 = vperm.xlu1 %1978, %v35_v3   ;;  %44 = vperm.xlu0 %1977, %v33_v5   ;;  %v229_v13 = vld [vmem:[%s2490_s4 + $0x8] sm:$0xff]  ;;  %v230_v15 = vld [vmem:[%s2490_s4 + $0x10] sm:$0x1f]  ;;  %v2106_v16 = vld [vmem:[%s2489_s3] sm:$0xff]  ;;  %v31_v31 = vand.u32 127, %v30_v30  ;;  %vm655_vm11 = vcmask 1040384  }
   0x7   :  { %1892 = vmatprep.subr.bf16.mxu0 %v1891_v7  ;;  %v1895_v14 = vpack.c.bf16 %v229_v13, %v228_v12  ;;  %v2111_v17 = vld [vmem:[%s2489_s3 + $0x8] sm:$0xff]  ;;  %1789 = vmatprep.mubr.msk.f32.mxu1 %vm231_vm1, %v2106_v16  ;;  %v2118_v18 = vld [vmem:[%s2489_s3 + $0x10] sm:$0xff]  ;;  %v377_v20 = vld [vmem:[%s2491_s5 + $0x20] sm:$0xff]  ;;  %vm630_vm12 = vcmask 138240   ;;  %vm1209_vm13 = vcmask 1043456   ;;  %vm1192_vm14 = vcmask 31744  }
   0x8   :  { %1894 = vmatpush3.bf16.msra.mxu0 %v1891_v7  ;;  %v374_v19 = vld [vmem:[%s2491_s5 + $0x8] sm:$0xff]  ;;  %v2133_v21 = vld [vmem:[%s2489_s3 + $0x18] sm:$0xff]  ;;  %v375_v23 = vld [vmem:[%s2491_s5 + $0x10] sm:$0xff]  ;;  %s2010_s21 = smov [#allocation2]  }
   0x9   :  { %1896 = vmatprep.subr.bf16.mxu1 %v1895_v14  ;;  %v1899_v22 = vpack.c.bf16 %v377_v20, %v374_v19  ;;  %v378_v24 = vld [vmem:[%s2491_s5 + $0x28] sm:$0xff]  ;;  %v2144_v25 = vld [vmem:[%s2489_s3 + $0x20] sm:$0xff]  ;;  %v2158_v28 = vld [vmem:[%s2489_s3 + $0x30] sm:$0xff]  ;;  %s1541_s22 = sshll.u32 %s2010_s21, 4  ;;  %s1542_s22 = int_to_ptr.vmem [resolvable:$true] %s1541_s22 }
   0xa   :  { %56 = vperm.xlu1 %1978, %v37_v8   ;;  %53 = vperm.xlu0 %1977, %v36_v9   ;;  %v1903_v26 = vpack.c.bf16 %v378_v24, %v375_v23  ;;  %v2153_v27 = vld [vmem:[%s2489_s3 + $0x28] sm:$0xff]  ;;  %v2167_v29 = vld [vmem:[%s2489_s3 + $0x38] sm:$0xff]  ;;  %v373_v34 = vld [vmem:[%s2491_s5] sm:$0xff]  ;;  %p1988_p1 = scmp.lt.s32.totalorder %s1542_s22, %s1542_s22 }
   0xb   :  { %1898 = vmatpush3.bf16.msra.mxu1 %v1895_v14  ;;  %1900 = vmatprep.subr.bf16.mxu0 %v1899_v22  ;;  %v376_v35 = vld [vmem:[%s2491_s5 + $0x18] sm:$0xff]  ;;  %v623_v52 = vld [vmem:[%s2491_s5 + $0x40] sm:$0xff]  ;;  %v625_v56 = vld [vmem:[%s2491_s5 + $0x50] sm:$0xff] }
   0xc   :  { %1787 = vmatprep.subr.msk.mxu1 %vm256_vm0, %v230_v15  ;;  %v1901_v40 = vpack.c.bf16 %v376_v35, %v373_v34  ;;  %v626_v53 = vld [vmem:[%s2491_s5 + $0x58] sm:$0xff]  ;;  %v621_v2 = vld [vmem:[%s2491_s5 + $0x30] sm:$0xff]  ;;  %v624_v3 = vld [vmem:[%s2491_s5 + $0x48] sm:$0xff] }
   0xd   :  { %v1911_v54 = vpack.c.bf16 %v626_v53, %v623_v52  ;;  %v622_v55 = vld [vmem:[%s2491_s5 + $0x38] sm:$0xff]  ;;  %v1909_v7 = vpack.c.bf16 %v624_v3, %v621_v2  ;;  %v628_v9 = vld [vmem:[%s2491_s5 + $0x68] sm:$0x1]  ;;  %v925_v23 = vld [vmem:[%s2492_s6 + $0x90] sm:$0xff] }
   0xe   :  { %62 = vperm.xlu1 %1978, %v39_v10   ;;  %59 = vperm.xlu0 %1977, %v38_v11   ;;  %v1907_v57 = vpack.c.bf16 %v625_v56, %v622_v55  ;;  %v629_v10 = vld [vmem:[%s2491_s5 + $0x70] sm:$0x1]  ;;  %v923_v11 = vld [vmem:[%s2492_s6 + $0x80] sm:$0xff]  ;;  %v924_v12 = vld [vmem:[%s2492_s6 + $0x88] sm:$0xff] }
   0xf   :  { %1788 = vmatpush3.msk.msra.mxu1 %vm256_vm0, %v230_v15  ;;  %v627_v15 = vld [vmem:[%s2491_s5 + $0x60] sm:$0x1]  ;;  %v908_v22 = vld [vmem:[%s2492_s6 + $0x8] sm:$0xff]  ;;  %v926_v24 = vld [vmem:[%s2492_s6 + $0x98] sm:$0xff]  ;;  %vm1340_vm0 = vcmask 523264  }
  0x10   :  { %1790 = vmatmul.mubr.msk.f32.vlgmr.msra.gmra.mrb[0].mxu1 %vm231_vm1, %v2111_v17  ;;  %1904 = vmatprep.subr.bf16.mxu1 %v1903_v26  ;;  %v931_v52 = vld [vmem:[%s2492_s6 + $0xc0] sm:$0xff]  ;;  %v932_v53 = vld [vmem:[%s2492_s6 + $0xc8] sm:$0xff] }
  0x11   :  { %1792 = vmatprep.mubr.msk.f32.mxu1 %vm231_vm1, %v2118_v18  ;;  %1906 = vmatpush3.bf16.msra.mxu1 %v1903_v26  ;;  %v915_v55 = vld [vmem:[%s2492_s6 + $0x40] sm:$0xff]  ;;  %v916_v56 = vld [vmem:[%s2492_s6 + $0x48] sm:$0xff] }
  0x12   :  { %1908 = vmatprep.subr.bf16.mxu1 %v1907_v57  ;;  %1176 = vrot.lane.b32.xlu0 %v2106_v16, %s2009_s16  ;;  %v1915_v16 = vpack.c.bf16 %v924_v12, %v923_v11  ;;  %v1933_v57 = vpack.c.bf16 %v916_v56, %v915_v55  ;;  %v919_v3 = vld [vmem:[%s2492_s6 + $0x60] sm:$0xff]  ;;  %v921_v11 = vld [vmem:[%s2492_s6 + $0x70] sm:$0xff]  ;;  %v922_v12 = vld [vmem:[%s2492_s6 + $0x78] sm:$0xff] }
  0x13   :  { %1178 = vrot.lane.b32.xlu1 %v2111_v17, %s2009_s16 }
  0x14   :  { %1793 = vmatmul.mubr.msk.f32.gmra.mrb[2].mxu1 %vm231_vm1, %v2133_v21 }
  0x15   :  { %1795 = vmatprep.mubr.msk.f32.mxu1 %vm231_vm1, %v2144_v25 }
  0x16   :  { %1180 = vrot.lane.b32.xlu0 %v2118_v18, %s2009_s16 }
  0x17   :  { %1182 = vrot.lane.b32.xlu1 %v2133_v21, %s2009_s16  ;;  %v907_v21 = vld [vmem:[%s2492_s6] sm:$0xff] }
  0x18   :  { %1796 = vmatmul.mubr.msk.f32.gmra.mrb[4].mxu1 %vm231_vm1, %v2153_v27  ;;  %v1917_v26 = vpack.c.bf16 %v908_v22, %v907_v21 }
  0x19   :  { %1798 = vmatprep.mubr.msk.f32.mxu1 %vm231_vm1, %v2158_v28 }
  0x1a   :  { %1184 = vrot.lane.b32.xlu0 %v2144_v25, %s2009_s16 }
  0x1b   :  { %1186 = vrot.lane.b32.xlu1 %v2153_v27, %s2009_s16  ;;  %v1919_v27 = vpack.c.bf16 %v926_v24, %v925_v23 }
  0x1c   :  { %1799 = vmatmul.mubr.msk.f32.gmra.mrb[6].mxu1 %vm231_vm1, %v2167_v29 }
  0x1e   :  { %1188 = vrot.lane.b32.xlu0 %v2158_v28, %s2009_s16  ;;  %v909_v28 = vld [vmem:[%s2492_s6 + $0x10] sm:$0xff] }
  0x1f   :  { %1190 = vrot.lane.b32.xlu1 %v2167_v29, %s2009_s16  ;;  %v910_v29 = vld [vmem:[%s2492_s6 + $0x18] sm:$0xff] }
  0x20   :  { %v1921_v34 = vpack.c.bf16 %v910_v29, %v909_v28 }
  0x81   :  { %v48_v32 = vpop.permute.xlu1 %47  ;;  %v42_v33 = vpop.permute.xlu0 %41 }
  0x82   :  { %vm64_vm3 = vcmp.eq.s32.totalorder %v42_v33, %v31_v31  ;;  %vm66_vm4 = vcmp.eq.s32.totalorder %v48_v32, %v31_v31  ;;  %v928_v32 = vld [vmem:[%s2492_s6 + $0xa8] sm:$0xff] }
  0x83   :  { %v1552_v37 = vsel %vm64_vm3, 1.0, %v2008_v36  ;;  %v1554_v41 = vsel %vm66_vm4, 1.0, %v2008_v36 }
  0x84   :  { %1771 = vmatprep.mubr.msk.f32.mxu0 %vm90_vm2, %v1552_v37  ;;  %v911_v37 = vld [vmem:[%s2492_s6 + $0x20] sm:$0xff] }
  0x85   :  { %v51_v38 = vpop.permute.xlu1 %50  ;;  %v45_v39 = vpop.permute.xlu0 %44 }
  0x86   :  { %vm67_vm5 = vcmp.eq.s32.totalorder %v51_v38, %v31_v31  ;;  %vm65_vm6 = vcmp.eq.s32.totalorder %v45_v39, %v31_v31  ;;  %v912_v38 = vld [vmem:[%s2492_s6 + $0x28] sm:$0xff] }
  0x87   :  { %v1553_v42 = vsel %vm65_vm6, 1.0, %v2008_v36  ;;  %v1555_v43 = vsel %vm67_vm5, 1.0, %v2008_v36 }
  0x88   :  { %1772 = vmatmul.mubr.msk.f32.vlgmr.msra.gmra.mrb[0].mxu0 %vm90_vm2, %v1553_v42 }
  0x89   :  { %v57_v44 = vpop.permute.xlu1 %56  ;;  %v54_v45 = vpop.permute.xlu0 %53  ;;  %1774 = vmatprep.mubr.msk.f32.mxu0 %vm90_vm2, %v1554_v41  ;;  %1902 = vmatpush1.bf16.msra.mxu0 %v1901_v40  ;;  %v1925_v40 = vpack.c.bf16 %v912_v38, %v911_v37 }
  0x8a   :  { %vm68_vm7 = vcmp.eq.s32.totalorder %v54_v45, %v31_v31  ;;  %vm69_vm8 = vcmp.eq.s32.totalorder %v57_v44, %v31_v31  ;;  %1912 = vmatprep.subr.bf16.mxu0 %v1911_v54 }
  0x8b   :  { %v1556_v46 = vsel %vm68_vm7, 1.0, %v2008_v36  ;;  %v1557_v49 = vsel %vm69_vm8, 1.0, %v2008_v36 }
  0x8c   :  { %1775 = vmatmul.mubr.msk.f32.gmra.mrb[2].mxu0 %vm90_vm2, %v1555_v43 }
  0x8d   :  { %v63_v47 = vpop.permute.xlu1 %62  ;;  %v60_v48 = vpop.permute.xlu0 %59  ;;  %1777 = vmatprep.mubr.msk.f32.mxu0 %vm90_vm2, %v1556_v46  ;;  %v929_v46 = vld [vmem:[%s2492_s6 + $0xb0] sm:$0xff] }
  0x8e   :  { %vm70_vm9 = vcmp.eq.s32.totalorder %v60_v48, %v31_v31  ;;  %vm71_vm10 = vcmp.eq.s32.totalorder %v63_v47, %v31_v31  ;;  %v927_v31 = vld [vmem:[%s2492_s6 + $0xa0] sm:$0xff]  ;;  %v930_v47 = vld [vmem:[%s2492_s6 + $0xb8] sm:$0xff] }
  0x8f   :  { %v1558_v50 = vsel %vm70_vm9, 1.0, %v2008_v36  ;;  %v1559_v51 = vsel %vm71_vm10, 1.0, %v2008_v36  ;;  %v1923_v35 = vpack.c.bf16 %v928_v32, %v927_v31  ;;  %v1927_v48 = vpack.c.bf16 %v930_v47, %v929_v46 }
  0x90   :  { %1778 = vmatmul.mubr.msk.f32.gmra.mrb[4].mxu0 %vm90_vm2, %v1557_v49  ;;  %v913_v49 = vld [vmem:[%s2492_s6 + $0x30] sm:$0xff] }
  0x91   :  { %1780 = vmatprep.mubr.msk.f32.mxu0 %vm90_vm2, %v1558_v50  ;;  %v914_v50 = vld [vmem:[%s2492_s6 + $0x38] sm:$0xff] }
  0x94   :  { %1781 = vmatmul.mubr.msk.f32.gmra.mrb[6].mxu0 %vm90_vm2, %v1559_v51  ;;  %v1929_v51 = vpack.c.bf16 %v914_v50, %v913_v49 }
  0x95   :  { %467 = vmatprep.mubr.f32.mxu0 %v2008_v36 }
  0xe3   :  { %v2207_v58 = vpop.f32.mrb[0].mxu1 }
  0xe4   :  { %v2209_v59 = vpop.f32.mrb[1].mxu1  ;;  %v366_v33 = vmax.f32 %v2207_v58, 0.0  ;;  %v933_v58 = vld [vmem:[%s2492_s6 + $0xd0] sm:$0xff] }
  0xe5   :  { %v365_v25 = vmax.f32 %v2209_v59, 0.0  ;;  %v934_v59 = vld [vmem:[%s2492_s6 + $0xd8] sm:$0xff] }
  0xe7   :  { %v2211_v60 = vpop.f32.mrb[2].mxu1 }
  0xe8   :  { %v2213_v61 = vpop.f32.mrb[3].mxu1  ;;  %v368_v41 = vmax.f32 %v2211_v60, 0.0  ;;  %v1935_v60 = vpack.c.bf16 %v934_v59, %v933_v58 }
  0xe9   :  { %v367_v39 = vmax.f32 %v2213_v61, 0.0  ;;  %v917_v61 = vld [vmem:[%s2492_s6 + $0x50] sm:$0xff] }
  0xeb   :  { %v2215_v62 = vpop.f32.mrb[4].mxu1 }
  0xec   :  { %v2217_v63 = vpop.f32.mrb[5].mxu1  ;;  %v370_v43 = vmax.f32 %v2215_v62, 0.0  ;;  %v918_v62 = vld [vmem:[%s2492_s6 + $0x58] sm:$0xff] }
  0xed   :  { %v369_v42 = vmax.f32 %v2217_v63, 0.0  ;;  %v1937_v63 = vpack.c.bf16 %v918_v62, %v917_v61 }
  0xef   :  { %v2219_v0 = vpop.f32.mrb[6].mxu1 }
  0xf0   :  { %v2221_v1 = vpop.f32.mrb[7].mxu1  ;;  %v372_v45 = vmax.f32 %v2219_v0, 0.0  ;;  %v935_v0 = vld [vmem:[%s2492_s6 + $0xe0] sm:$0xff] }
  0xf1   :  { %v371_v44 = vmax.f32 %v2221_v1, 0.0  ;;  %v936_v1 = vld [vmem:[%s2492_s6 + $0xe8] sm:$0xff] }
  0xf2   :  { %v1939_v2 = vpack.c.bf16 %v936_v1, %v935_v0 }
 0x15b   :  { %v1773_v5 = vpop.f32.mrb[0].mxu0 }
 0x15c   :  { %v181_v8 = vpop.f32.mrb[1].mxu0 }
 0x15d   :  { %1577 = vmatmul.mubr.msk.f32.vlgmr.msra.gmra.mrb[8].mxu0 %vm90_vm2, %v181_v8  ;;  %1805 = vmatprep.mubr.msk.f32.mxu1 %vm90_vm2, %v181_v8  ;;  %v937_v8 = vld [vmem:[%s2492_s6 + $0xf0] sm:$0xff] }
 0x15e   :  { %1806 = vmatmul.mubr.msk.f32.vlgmr.msra.gmra.mrb[8].mxu1 %vm90_vm2, %v1773_v5  ;;  %1914 = vmatpush3.bf16.msra.mxu0 %v1911_v54  ;;  %v1931_v54 = vpack.c.bf16 %v932_v53, %v931_v52 }
 0x15f   :  { %v1776_v13 = vpop.f32.mrb[2].mxu0  ;;  %473 = vmatprep.mubr.f32.mxu0 %v2008_v36  ;;  %1910 = vmatpush1.bf16.msra.mxu1 %v1909_v7 }
 0x160   :  { %v191_v14 = vpop.f32.mrb[3].mxu0  ;;  %1593 = vmatprep.subr.msk.mxu1 %vm655_vm11, %v628_v9  ;;  %1821 = vmatprep.subr.msk.mxu0 %vm655_vm11, %v629_v10  ;;  %v938_v9 = vld [vmem:[%s2492_s6 + $0xf8] sm:$0xff] }
 0x161   :  { %1578 = vmatmul.mubr.msk.f32.gmra.mrb[10].mxu0 %vm90_vm2, %v1773_v5  ;;  %1808 = vmatprep.mubr.msk.f32.mxu1 %vm90_vm2, %v191_v14  ;;  %v920_v5 = vld [vmem:[%s2492_s6 + $0x68] sm:$0xff] }
 0x162   :  { %1809 = vmatmul.mubr.msk.f32.gmra.mrb[10].mxu1 %vm90_vm2, %v1776_v13  ;;  %479 = vmatprep.mubr.f32.mxu0 %v2008_v36  ;;  %v1941_v7 = vpack.c.bf16 %v920_v5, %v919_v3 }
 0x163   :  { %v1779_v17 = vpop.f32.mrb[4].mxu0  ;;  %1594 = vmatpush1.msk.msra.mxu1 %vm655_vm11, %v627_v15  ;;  %1822 = vmatpush3.msk.msra.mxu0 %vm655_vm11, %v629_v10  ;;  %v1943_v10 = vpack.c.bf16 %v938_v9, %v937_v8  ;;  %v940_v15 = vld [vmem:[%s2492_s6 + $0x108] sm:$0xff] }
 0x164   :  { %v201_v18 = vpop.f32.mrb[5].mxu0  ;;  %1916 = vmatprep.subr.bf16.mxu1 %v1915_v16 }
 0x165   :  { %1579 = vmatmul.mubr.msk.f32.gmra.mrb[12].mxu0 %vm90_vm2, %v191_v14  ;;  %1811 = vmatprep.mubr.msk.f32.mxu1 %vm90_vm2, %v201_v18  ;;  %v939_v14 = vld [vmem:[%s2492_s6 + $0x100] sm:$0xff] }
 0x166   :  { %1812 = vmatmul.mubr.msk.f32.gmra.mrb[12].mxu1 %vm90_vm2, %v1779_v17  ;;  %485 = vmatprep.mubr.f32.mxu0 %v2008_v36  ;;  %v1947_v16 = vpack.c.bf16 %v940_v15, %v939_v14  ;;  %v1177_v15 = vpop.permute.xlu0 %1176 }
 0x167   :  { %v1782_v19 = vpop.f32.mrb[6].mxu0 }
 0x168   :  { %v211_v20 = vpop.f32.mrb[7].mxu0  ;;  %1948 = vmatprep.subr.bf16.mxu0 %v1947_v16 }
 0x169   :  { %1580 = vmatmul.mubr.msk.f32.gmra.mrb[14].mxu0 %vm90_vm2, %v1776_v13  ;;  %1814 = vmatprep.mubr.msk.f32.mxu1 %vm90_vm2, %v211_v20  ;;  %v1945_v13 = vpack.c.bf16 %v922_v12, %v921_v11 }
 0x16a   :  { %1815 = vmatmul.mubr.msk.f32.gmra.mrb[14].mxu1 %vm90_vm2, %v1782_v19  ;;  %491 = vmatprep.mubr.f32.mxu0 %v2008_v36 }
 0x16b   :  { %729 = vmatprep.mubr.f32.mxu1 %v2008_v36 }
 0x16d   :  { %1581 = vmatmul.mubr.msk.f32.gmra.mrb[16].mxu0 %vm90_vm2, %v201_v18 }
 0x16e   :  { %1595 = vmatmul.mubr.msk.f32.vlgmr.msra.gmra.mrb[16].mxu1 %vm630_vm12, %v365_v25  ;;  %497 = vmatprep.mubr.f32.mxu0 %v2008_v36 }
 0x16f   :  { %735 = vmatprep.mubr.f32.mxu1 %v2008_v36  ;;  %1918 = vmatpush3.bf16.msra.mxu1 %v1917_v26 }
 0x170   :  { %1920 = vmatprep.subr.bf16.mxu1 %v1919_v27 }
 0x171   :  { %1582 = vmatmul.mubr.msk.f32.gmra.mrb[18].mxu0 %vm90_vm2, %v1779_v17  ;;  %v2410_v17 = vld [vmem:[%s2492_s6 + $0x110] sm:$0xf] }
 0x172   :  { %1596 = vmatmul.mubr.msk.f32.gmra.mrb[18].mxu1 %vm630_vm12, %v366_v33  ;;  %503 = vmatprep.mubr.f32.mxu0 %v2008_v36 }
 0x173   :  { %741 = vmatprep.mubr.f32.mxu1 %v2008_v36  ;;  %1922 = vmatpush3.bf16.msra.mxu1 %v1921_v34 }
 0x174   :  { %1924 = vmatprep.subr.bf16.mxu1 %v1923_v35 }
 0x175   :  { %1583 = vmatmul.mubr.msk.f32.gmra.mrb[20].mxu0 %vm90_vm2, %v211_v20 }
 0x176   :  { %1597 = vmatmul.mubr.msk.f32.gmra.mrb[20].mxu1 %vm630_vm12, %v367_v39  ;;  %509 = vmatprep.mubr.f32.mxu0 %v2008_v36 }
 0x177   :  { %747 = vmatprep.mubr.f32.mxu1 %v2008_v36  ;;  %1926 = vmatpush3.bf16.msra.mxu1 %v1925_v40 }
 0x178   :  { %1928 = vmatprep.subr.bf16.mxu1 %v1927_v48 }
 0x179   :  { %1584 = vmatmul.mubr.msk.f32.gmra.mrb[22].mxu0 %vm90_vm2, %v1782_v19 }
 0x17a   :  { %1598 = vmatmul.mubr.msk.f32.gmra.mrb[22].mxu1 %vm630_vm12, %v368_v41  ;;  %1823 = vmatprep.mubr.msk.f32.mxu0 %vm630_vm12, %v365_v25 }
 0x17b   :  { %753 = vmatprep.mubr.f32.mxu1 %v2008_v36  ;;  %1930 = vmatpush3.bf16.msra.mxu1 %v1929_v51 }
 0x17c   :  { %1932 = vmatprep.subr.bf16.mxu1 %v1931_v54 }
 0x17d   :  { %1824 = vmatmul.mubr.msk.f32.vlgmr.msra.gmra.mrb[24].mxu0 %vm630_vm12, %v366_v33 }
 0x17e   :  { %1599 = vmatmul.mubr.msk.f32.gmra.mrb[24].mxu1 %vm630_vm12, %v369_v42  ;;  %1826 = vmatprep.mubr.msk.f32.mxu0 %vm630_vm12, %v367_v39 }
 0x17f   :  { %759 = vmatprep.mubr.f32.mxu1 %v2008_v36  ;;  %1934 = vmatpush3.bf16.msra.mxu1 %v1933_v57 }
 0x180   :  { %1936 = vmatprep.subr.bf16.mxu1 %v1935_v60  ;;  %1950 = vmatpush3.bf16.msra.mxu0 %v1947_v16 }
 0x181   :  { %1827 = vmatmul.mubr.msk.f32.gmra.mrb[26].mxu0 %vm630_vm12, %v368_v41  ;;  %1851 = vmatprep.subr.msk.mxu0 %vm1209_vm13, %v2410_v17 }
 0x182   :  { %1600 = vmatmul.mubr.msk.f32.gmra.mrb[26].mxu1 %vm630_vm12, %v370_v43  ;;  %1829 = vmatprep.mubr.msk.f32.mxu0 %vm630_vm12, %v369_v42 }
 0x183   :  { %765 = vmatprep.mubr.f32.mxu1 %v2008_v36  ;;  %1938 = vmatpush3.bf16.msra.mxu1 %v1937_v63 }
 0x184   :  { %1940 = vmatprep.subr.bf16.mxu1 %v1939_v2 }
 0x185   :  { %1830 = vmatmul.mubr.msk.f32.gmra.mrb[28].mxu0 %vm630_vm12, %v370_v43 }
 0x186   :  { %1601 = vmatmul.mubr.msk.f32.gmra.mrb[28].mxu1 %vm630_vm12, %v371_v44  ;;  %1832 = vmatprep.mubr.msk.f32.mxu0 %vm630_vm12, %v371_v44 }
 0x187   :  { %771 = vmatprep.mubr.f32.mxu1 %v2008_v36  ;;  %1942 = vmatpush3.bf16.msra.mxu1 %v1941_v7 }
 0x188   :  { %1944 = vmatprep.subr.bf16.mxu1 %v1943_v10 }
 0x189   :  { %1833 = vmatmul.mubr.msk.f32.gmra.mrb[30].mxu0 %vm630_vm12, %v372_v45 }
 0x18a   :  { %1602 = vmatmul.mubr.msk.f32.gmra.mrb[30].mxu1 %vm630_vm12, %v372_v45 }
 0x18b   :  { %1946 = vmatpush3.bf16.msra.mxu1 %v1945_v13 }
 0x230   :  { %v469_v18 = vpop.f32.mrb[8].mxu0 }
 0x231   :  { %v471_v19 = vpop.f32.mrb[9].mxu0  ;;  %v1807_v20 = vpop.f32.mrb[8].mxu1 }
 0x232   :  { %v582_v21 = vpop.f32.mrb[9].mxu1 }
 0x234   :  { %v475_v22 = vpop.f32.mrb[10].mxu0 }
 0x235   :  { %v477_v23 = vpop.f32.mrb[11].mxu0  ;;  %v1810_v24 = vpop.f32.mrb[10].mxu1 }
 0x236   :  { %v592_v25 = vpop.f32.mrb[11].mxu1 }
 0x238   :  { %v481_v26 = vpop.f32.mrb[12].mxu0 }
 0x239   :  { %v483_v27 = vpop.f32.mrb[13].mxu0  ;;  %v1813_v28 = vpop.f32.mrb[12].mxu1 }
 0x23a   :  { %v2414_v29 = vpop.f32.mrb[13].mxu1 }
 0x23c   :  { %v487_v31 = vpop.f32.mrb[14].mxu0 }
 0x23d   :  { %v489_v32 = vpop.f32.mrb[15].mxu0  ;;  %v2416_v33 = vpop.f32.mrb[14].mxu1 }
 0x23e   :  { %v2418_v34 = vpop.f32.mrb[15].mxu1 }
 0x240   :  { %v493_v35 = vpop.f32.mrb[16].mxu0 }
 0x241   :  { %v495_v37 = vpop.f32.mrb[17].mxu0  ;;  %v731_v38 = vpop.f32.mrb[16].mxu1 }
 0x242   :  { %v883_v39 = vmul.f32 %v731_v38, %v469_v18  ;;  %v733_v40 = vpop.f32.mrb[17].mxu1 }
 0x243   :  { %v884_v41 = vmul.f32 %v733_v40, %v471_v19  ;;  %v1435_v40 = vld [vmem:[%s2493_s7 + $0x8] sm:$0xff] }
 0x244   :  { %v499_v42 = vpop.f32.mrb[18].mxu0 }
 0x245   :  { %v501_v43 = vpop.f32.mrb[19].mxu0  ;;  %v737_v44 = vpop.f32.mrb[18].mxu1  ;;  %1029 = vmatprep.mubr.f32.mxu1 %v884_v41 }
 0x246   :  { %v886_v45 = vmul.f32 %v737_v44, %v475_v22  ;;  %v739_v46 = vpop.f32.mrb[19].mxu1  ;;  %1030 = vmatmul.mubr.f32.vlgmr.msra.gmra.mrb[32].mxu1 %v883_v39  ;;  %v1629_v44 = vld [vmem:[%s2488_s2] ss:$0 sm:$0xff] }
 0x247   :  { %v887_v47 = vmul.f32 %v739_v46, %v477_v23 }
 0x248   :  { %v505_v48 = vpop.f32.mrb[20].mxu0 }
 0x249   :  { %v507_v49 = vpop.f32.mrb[21].mxu0  ;;  %v743_v50 = vpop.f32.mrb[20].mxu1  ;;  %1034 = vmatprep.mubr.f32.mxu1 %v887_v47 }
 0x24a   :  { %v889_v51 = vmul.f32 %v743_v50, %v481_v26  ;;  %v745_v52 = vpop.f32.mrb[21].mxu1  ;;  %1035 = vmatmul.mubr.f32.gmra.mrb[34].mxu1 %v886_v45 }
 0x24b   :  { %v890_v53 = vmul.f32 %v745_v52, %v483_v27 }
 0x24c   :  { %v511_v54 = vpop.f32.mrb[22].mxu0 }
 0x24d   :  { %v513_v55 = vpop.f32.mrb[23].mxu0  ;;  %v749_v56 = vpop.f32.mrb[22].mxu1  ;;  %1039 = vmatprep.mubr.f32.mxu1 %v890_v53 }
 0x24e   :  { %v892_v57 = vmul.f32 %v749_v56, %v487_v31  ;;  %v751_v58 = vpop.f32.mrb[23].mxu1  ;;  %1040 = vmatmul.mubr.f32.gmra.mrb[36].mxu1 %v889_v51 }
 0x24f   :  { %v893_v59 = vmul.f32 %v751_v58, %v489_v32 }
 0x250   :  { %v1825_v60 = vpop.f32.mrb[24].mxu0 }
 0x251   :  { %v888_v61 = vmul.f32 %v1825_v60, %v1807_v20  ;;  %v755_v62 = vpop.f32.mrb[24].mxu1  ;;  %v844_v63 = vpop.f32.mrb[25].mxu0  ;;  %1044 = vmatprep.mubr.f32.mxu1 %v893_v59 }
 0x252   :  { %v895_v0 = vmul.f32 %v755_v62, %v493_v35  ;;  %v885_v1 = vmul.f32 %v844_v63, %v582_v21  ;;  %v757_v2 = vpop.f32.mrb[25].mxu1  ;;  %1045 = vmatmul.mubr.f32.gmra.mrb[38].mxu1 %v892_v57  ;;  %v1181_v35 = vpop.permute.xlu0 %1180 }
 0x253   :  { %v896_v3 = vmul.f32 %v757_v2, %v495_v37 }
 0x254   :  { %v1828_v5 = vpop.f32.mrb[26].mxu0  ;;  %1839 = vmatprep.mubr.msk.f32.mxu0 %vm90_vm2, %v885_v1 }
 0x255   :  { %v894_v7 = vmul.f32 %v1828_v5, %v1810_v24  ;;  %v761_v8 = vpop.f32.mrb[26].mxu1  ;;  %v854_v9 = vpop.f32.mrb[27].mxu0  ;;  %1049 = vmatprep.mubr.f32.mxu1 %v896_v3  ;;  %1840 = vmatmul.mubr.msk.f32.vlgmr.msra.gmra.mrb[32].mxu0 %vm90_vm2, %v888_v61 }
 0x256   :  { %v898_v10 = vmul.f32 %v761_v8, %v499_v42  ;;  %v891_v11 = vmul.f32 %v854_v9, %v592_v25  ;;  %v763_v12 = vpop.f32.mrb[27].mxu1  ;;  %1050 = vmatmul.mubr.f32.gmra.mrb[40].mxu1 %v895_v0  ;;  %1852 = vmatpush3.msk.msra.mxu0 %vm1209_vm13, %v2410_v17  ;;  %v1179_v17 = vpop.permute.xlu1 %1178  ;;  %v2452_v42 = vshrl.u32 %v30_v30, 7 }
 0x257   :  { %v899_v13 = vmul.f32 %v763_v12, %v501_v43 }
 0x258   :  { %v1831_v14 = vpop.f32.mrb[28].mxu0  ;;  %1842 = vmatprep.mubr.msk.f32.mxu0 %vm90_vm2, %v891_v11  ;;  %v1328_v43 = vadd.s32 8, %v2452_v42  ;;  %vm1334_vm15 = vcmp.eq.s32.totalorder %v2452_v42, %v1629_v44 }
 0x259   :  { %v900_v16 = vmul.f32 %v1831_v14, %v1813_v28  ;;  %v767_v18 = vpop.f32.mrb[28].mxu1  ;;  %v864_v19 = vpop.f32.mrb[29].mxu0  ;;  %1054 = vmatprep.mubr.f32.mxu1 %v899_v13  ;;  %1843 = vmatmul.mubr.msk.f32.gmra.mrb[34].mxu0 %vm90_vm2, %v894_v7  ;;  %v1630_v45 = vsel %vm1334_vm15, 1.0, %v2008_v36 }
 0x25a   :  { %v901_v20 = vmul.f32 %v767_v18, %v505_v48  ;;  %v897_v21 = vmul.f32 %v864_v19, %v2414_v29  ;;  %v769_v22 = vpop.f32.mrb[29].mxu1  ;;  %1055 = vmatmul.mubr.f32.gmra.mrb[42].mxu1 %v898_v10  ;;  %vm1335_vm1 = vcmp.eq.s32.totalorder %v1328_v43, %v1629_v44 }
 0x25b   :  { %v902_v23 = vmul.f32 %v769_v22, %v507_v49  ;;  %v2461_v46 = vsel %vm1335_vm1, 1.0, %v2008_v36 }
 0x25c   :  { %v1834_v24 = vpop.f32.mrb[30].mxu0  ;;  %1845 = vmatprep.mubr.msk.f32.mxu0 %vm90_vm2, %v897_v21  ;;  %v1425_v30 = vsel %vm1340_vm0, %v2461_v46, 0.0 }
 0x25d   :  { %v906_v25 = vmul.f32 %v1834_v24, %v2416_v33  ;;  %v773_v26 = vpop.f32.mrb[30].mxu1  ;;  %v874_v27 = vpop.f32.mrb[31].mxu0  ;;  %1059 = vmatprep.mubr.f32.mxu1 %v902_v23  ;;  %1846 = vmatmul.mubr.msk.f32.gmra.mrb[36].mxu0 %vm90_vm2, %v900_v16 }
 0x25e   :  { %v904_v28 = vmul.f32 %v773_v26, %v511_v54  ;;  %v903_v31 = vmul.f32 %v874_v27, %v2418_v34  ;;  %v775_v32 = vpop.f32.mrb[31].mxu1  ;;  %1060 = vmatmul.mubr.f32.gmra.mrb[44].mxu1 %v901_v20  ;;  %v1183_v33 = vpop.permute.xlu1 %1182  ;;  %1426 = vadd.xlane.f32.xlu1 %v1425_v30 }
 0x25f   :  { %v905_v29 = vmul.f32 %v775_v32, %v513_v55  ;;  %v1185_v34 = vpop.permute.xlu0 %1184 }
 0x260   :  { %1848 = vmatprep.mubr.msk.f32.mxu0 %vm90_vm2, %v903_v31 }
 0x261   :  { %1064 = vmatprep.mubr.f32.mxu1 %v905_v29  ;;  %1849 = vmatmul.mubr.msk.f32.gmra.mrb[38].mxu0 %vm90_vm2, %v906_v25 }
 0x262   :  { %1065 = vmatmul.mubr.f32.gmra.mrb[46].mxu1 %v904_v28  ;;  %1853 = vmatprep.mubr.msk.f32.mxu0 %vm1192_vm14, %v1177_v15  ;;  %v1187_v37 = vpop.permute.xlu1 %1186 }
 0x263   :  { %1888 = vmatprep.mubr.msk.f32.mxu1 %vm90_vm2, %v2070_v4  ;;  %v1189_v38 = vpop.permute.xlu0 %1188  ;;  %v1434_v4 = vld [vmem:[%s2493_s7] sm:$0xff] }
 0x264   :  { %v1967_v41 = vpack.c.bf16 %v1435_v40, %v1434_v4 }
 0x265   :  { %1854 = vmatmul.mubr.msk.f32.vlgmr.msra.gmra.mrb[40].mxu0 %vm1192_vm14, %v1179_v17 }
 0x266   :  { %1856 = vmatprep.mubr.msk.f32.mxu0 %vm1192_vm14, %v1181_v35  ;;  %v1191_v39 = vpop.permute.xlu1 %1190  ;;  %1968 = vmatprep.subr.bf16.mxu1 %v1967_v41 }
 0x267   :  { %1970 = vmatpush3.bf16.msra.mxu1 %v1967_v41 }
 0x269   :  { %1857 = vmatmul.mubr.msk.f32.gmra.mrb[42].mxu0 %vm1192_vm14, %v1183_v33 }
 0x26a   :  { %1859 = vmatprep.mubr.msk.f32.mxu0 %vm1192_vm14, %v1185_v34  ;;  %1889 = vmatmul.mubr.msk.f32.vlgmr.msra.gmra.mrb[48].mxu1 %vm90_vm2, %v2078_v6  ;;  %v1422_v6 = vsel %vm1340_vm0, %v1630_v45, 0.0 }
 0x26b   :  { %1423 = vadd.xlane.f32.xlu0 %v1422_v6 }
 0x26d   :  { %1860 = vmatmul.mubr.msk.f32.gmra.mrb[44].mxu0 %vm1192_vm14, %v1187_v37 }
 0x26e   :  { %1862 = vmatprep.mubr.msk.f32.mxu0 %vm1192_vm14, %v1189_v38 }
 0x271   :  { %1863 = vmatmul.mubr.msk.f32.gmra.mrb[46].mxu0 %vm1192_vm14, %v1191_v39 }
 0x272   :  { %1881 = vmatprep.mubr.msk.f32.mxu0 %vm1340_vm0, %v1630_v45 }
 0x319   :  { %v1710_v47 = vpop.f32.mrb[32].mxu1 }
 0x31a   :  { %v1711_v48 = vpop.f32.mrb[33].mxu1 }
 0x31b   :  { %v1712_v49 = vadd.f32 %v1711_v48, %v1710_v47  ;;  %v1427_v47 = vpop.xlane.xlu1 %1426  ;;  %v1424_v48 = vpop.xlane.xlu0 %1423 }
 0x31d   :  { %v1713_v50 = vpop.f32.mrb[34].mxu1 }
 0x31e   :  { %v1714_v51 = vpop.f32.mrb[35].mxu1 }
 0x31f   :  { %v1715_v52 = vadd.f32 %v1714_v51, %v1713_v50  ;;  %v1428_v50 = vmax.f32 %v1424_v48, 1.0  ;;  %v1520_v51 = vsub.s32 0, %v2452_v42 }
 0x321   :  { %v1716_v53 = vpop.f32.mrb[36].mxu1 }
 0x322   :  { %v1717_v54 = vpop.f32.mrb[37].mxu1 }
 0x323   :  { %v1718_v55 = vadd.f32 %v1717_v54, %v1716_v53 }
 0x325   :  { %v1719_v36 = vpop.f32.mrb[38].mxu1 }
 0x326   :  { %v1720_v56 = vpop.f32.mrb[39].mxu1 }
 0x327   :  { %v1721_v57 = vadd.f32 %v1720_v56, %v1719_v36 }
 0x328   :  { %v1841_v58 = vpop.f32.mrb[32].mxu0 }
 0x329   :  { %v1142_v59 = vadd.f32 %v1841_v58, %v1715_v52  ;;  %v1722_v60 = vpop.f32.mrb[40].mxu1  ;;  %v1136_v61 = vpop.f32.mrb[33].mxu0  ;;  %v1517_v52 = vld [vmem:[%s2493_s7 + $0x10] sm:$0x3]  ;;  %s1983_s7 = scalar_lea.vmem %s1542_s22, 256 }
 0x32a   :  { %v1137_v62 = vadd.f32 %v1712_v49, %v1136_v61  ;;  %v1723_v63 = vpop.f32.mrb[41].mxu1  ;;  %v1429_v49 = vmax.f32 %v1427_v47, 1.0  ;;  %v1521_v53 = vrot.slane %v1517_v52, %v1520_v51  ;;  %p1984_p0 = scmp.ne.s32.totalorder %s1542_s22, %s1983_s7  ;;  %p1989_p2 = scmp.lt.s32.totalorder %s1983_s7, %s1983_s7 }
 0x32b   :  { %v1724_v0 = vadd.f32 %v1723_v63, %v1722_v60 }
 0x32c   :  { %v1844_v1 = vpop.f32.mrb[34].mxu0  ;;  %1979 = vrcp.f32 %v1429_v49  ;;  %p1990_p3 = por %p1989_p2, %p1988_p1 }
 0x32d   :  { %v1152_v2 = vadd.f32 %v1844_v1, %v1721_v57  ;;  %v1725_v3 = vpop.f32.mrb[42].mxu1  ;;  %v1146_v5 = vpop.f32.mrb[35].mxu0  ;;  %1981 = vrcp.f32 %v1428_v50 }
 0x32e   :  { %v1147_v7 = vadd.f32 %v1718_v55, %v1146_v5  ;;  %v1726_v8 = vpop.f32.mrb[43].mxu1  ;;  %p1991_p4 = pnand %p1990_p3, %p1984_p0 }
 0x32f   :  { %v1727_v9 = vadd.f32 %v1726_v8, %v1725_v3 }
 0x330   :  { %v1847_v10 = vpop.f32.mrb[36].mxu0 }
 0x331   :  { %v1162_v11 = vadd.f32 %v1847_v10, %v1727_v9  ;;  %v1728_v12 = vpop.f32.mrb[44].mxu1  ;;  %v1156_v13 = vpop.f32.mrb[37].mxu0 }
 0x332   :  { %v1157_v14 = vadd.f32 %v1724_v0, %v1156_v13  ;;  %v1729_v15 = vpop.f32.mrb[45].mxu1 }
 0x333   :  { %v1730_v16 = vadd.f32 %v1729_v15, %v1728_v12 }
 0x334   :  { %v1850_v18 = vpop.f32.mrb[38].mxu0 }
 0x335   :  { %v1731_v19 = vpop.f32.mrb[46].mxu1  ;;  %v1166_v20 = vpop.f32.mrb[39].mxu0 }
 0x336   :  { %v1167_v21 = vadd.f32 %v1730_v16, %v1166_v20  ;;  %v1732_v22 = vpop.f32.mrb[47].mxu1  ;;  %v1980_v54 = vpop.eup %1979 }
 0x337   :  { %v1733_v23 = vadd.f32 %v1732_v22, %v1731_v19  ;;  %v1982_v55 = vpop.eup %1981  ;;  %v1523_v36 = vmul.f32 %v1980_v54, %v1521_v53 }
 0x338   :  { %v1855_v24 = vpop.f32.mrb[40].mxu0  ;;  %v1522_v56 = vmul.f32 %v1982_v55, %v1521_v53 }
 0x339   :  { %v1319_v17 = vmul.f32 %v1855_v24, %v1142_v59  ;;  %v1279_v25 = vpop.f32.mrb[41].mxu0  ;;  %v1172_v26 = vadd.f32 %v1850_v18, %v1733_v23 }
 0x33a   :  { %v1318_v27 = vmul.f32 %v1279_v25, %v1137_v62 }
 0x33c   :  { %v1951_v28 = vpack.c.bf16 %v1319_v17, %v1318_v27  ;;  %v1858_v31 = vpop.f32.mrb[42].mxu0 }
 0x33d   :  { %v1321_v32 = vmul.f32 %v1858_v31, %v1152_v2  ;;  %v1289_v29 = vpop.f32.mrb[43].mxu0  ;;  %v1890_v6 = vpop.f32.mrb[48].mxu1 }
 0x33e   :  { %v1320_v35 = vmul.f32 %v1289_v29, %v1147_v7  ;;  %1952 = vmatprep.subr.bf16.mxu0 %v1951_v28  ;;  %v1508_v30 = vpop.f32.mrb[49].mxu1 }
 0x33f   :  { %1954 = vmatpush3.bf16.msra.mxu0 %v1951_v28 }
 0x340   :  { %v1955_v33 = vpack.c.bf16 %v1321_v32, %v1320_v35  ;;  %v1861_v34 = vpop.f32.mrb[44].mxu0 }
 0x341   :  { %v1323_v37 = vmul.f32 %v1861_v34, %v1162_v11  ;;  %v1299_v38 = vpop.f32.mrb[45].mxu0 }
 0x342   :  { %v1322_v39 = vmul.f32 %v1299_v38, %v1157_v14  ;;  %1956 = vmatprep.subr.bf16.mxu0 %v1955_v33 }
 0x343   :  { %1958 = vmatpush3.bf16.msra.mxu0 %v1955_v33 }
 0x344   :  { %v1959_v4 = vpack.c.bf16 %v1323_v37, %v1322_v39  ;;  %v1864_v40 = vpop.f32.mrb[46].mxu0 }
 0x345   :  { %v1325_v41 = vmul.f32 %v1864_v40, %v1172_v26  ;;  %v1309_v43 = vpop.f32.mrb[47].mxu0 }
 0x346   :  { %v1324_v44 = vmul.f32 %v1309_v43, %v1167_v21  ;;  %1960 = vmatprep.subr.bf16.mxu0 %v1959_v4 }
 0x347   :  { %1962 = vmatpush3.bf16.msra.mxu0 %v1959_v4 }
 0x348   :  { %v1963_v45 = vpack.c.bf16 %v1325_v41, %v1324_v44 }
 0x34a   :  { %1964 = vmatprep.subr.bf16.mxu0 %v1963_v45 }
 0x34b   :  { %1966 = vmatpush3.bf16.msra.mxu0 %v1963_v45 }
 0x34e   :  { %1882 = vmatmul.mubr.msk.f32.vlgmr.msra.gmra.mrb[48].mxu0 %vm1340_vm0, %v2461_v46  ;;  %v1530_v46 = vsub.s32 1, %v2452_v42 }
 0x350   :  { %v1531_v60 = vrot.slane %v1517_v52, %v1530_v46 }
 0x421   :  { %v1883_v57 = vpop.f32.mrb[48].mxu0 }
 0x422   :  { %v1525_v58 = vmul.f32 %v1883_v57, %v1523_v36  ;;  %v1413_v59 = vpop.f32.mrb[49].mxu0 }
 0x423   :  { %v1524_v61 = vmul.f32 %v1522_v56, %v1413_v59 }
 0x424   :  { %v1527_v62 = vadd.f32 %v1890_v6, %v1525_v58 }
 0x425   :  { %v1526_v63 = vadd.f32 %v1524_v61, %v1508_v30 }
 0x426   :  { %v1533_v0 = vadd.f32 %v1531_v60, %v1527_v62 }
 0x427   :  { %v1532_v1 = vadd.f32 %v1531_v60, %v1526_v63 }
 0x428   :  { %1535 = vst [vmem:[#allocation2 + $0x8] sm:$0xff] %v1533_v0 }
 0x429   :  { %1534 = vst [vmem:[#allocation2] sm:$0xff] %v1532_v1 }
 0x42a   :  { %1994 = shalt.err (!%p1991_p4)
}
 0x42b   :  { %s1995_s25 = scalar_lea.hbm %s2494_s8, 256 }
 0x42c   :  { %p1996_p5 = scmp.ne.s32.totalorder %s2494_s8, %s1995_s25  ;;  %p1999_p6 = scmp.lt.u32.totalorder %s1995_s25, %s2494_s8 }
 0x42e   :  { %p2001_p7 = pnand %p1999_p6, %p1996_p5 }
 0x430   :  { %2004 = shalt.err (!%p2001_p7)
}
 0x431   :  { %s2011_s5 = smov 128   ;;  %s2012_s30 = smov 8  }
 0x432   :  { %1547 = dma.vmem_to_hbm [thread:$0]  %s1542_s22, 256, %s2494_s8, [#allocation3], %s2011_s5, %s2011_s5, %s2012_s30  }
 0x433   :  { %2005 = dma.done.wait [#allocation3], 256  }
 0x434   :  { %2006 = vsyncadd [#allocation3], 4294967040 }
 0x435   :  { %1551 = vsyncpa [#allocation3], 1 }

</bundles_post_ra>
